<compile_context>
chip_gen: v7x
topology: tpu7x:2x2x1
jax: 0.10.0
libtpu: 0.0.40
codegen_flags: <defaults>
</compile_context>

<pallas_src>
import jax
import jax.numpy as jnp
from jax.experimental import pallas as pl
from jax.experimental.pallas import tpu as pltpu

N_STATES = 8
N_ACTIONS = 4
HID = 128
D = 2 * HID           # fused tower width: [mu tower | log_var tower]
N_TOWER_LAYERS = 4    # Linear(256,128)+3x Linear(128,128) per branch, fused to 4x(256->256)


def planning_kernel(x_ref, eps_ref, we_ref, be_ref, wt_ref, bt_ref,
                    wh_ref, bh_ref, out_ref):
    f32 = jnp.float32
    bf16 = jnp.bfloat16
    dot = lambda a, b: jnp.dot(a.astype(bf16), b, preferred_element_type=f32)

    # Fused encoders: [relu(s @ Ws + bs) | relu(s_next @ Wsn + bsn)]  -> (B, 256)
    h = jnp.maximum(dot(x_ref[...], we_ref[...]) + be_ref[...], 0.0)

    # Lanes 0..127 -> planning_mu branch (Tanh); lanes 128..255 -> planning_log_var (ReLU)
    lanes = jax.lax.broadcasted_iota(jnp.int32, (x_ref.shape[0], D), 1)
    is_mu = lanes < HID

    for i in range(N_TOWER_LAYERS):                 # statically unrolled
        y = dot(h, wt_ref[i]) + bt_ref[i]
        h = jnp.where(is_mu, jnp.tanh(y), jnp.maximum(y, 0.0))

    # Fused heads: (B,256) @ (256, 2*A) -> [mu | log_var]
    y = dot(h, wh_ref[...]) + bh_ref[...]
    mu = y[:, :N_ACTIONS]
    log_var = y[:, N_ACTIONS:]

    # reparameterize: std = exp(0.5*logvar) + 1e-5, eps ~ U[0,1) (torch.rand_like)
    std = jnp.exp(0.5 * log_var) + 1e-5
    act = mu + std * eps_ref[...]

    # Single lane-contiguous output slab [act | mu | log_var] -> one write-back DMA.
    out_ref[:, 0:N_ACTIONS] = act
    out_ref[:, N_ACTIONS:2 * N_ACTIONS] = mu
    out_ref[:, 2 * N_ACTIONS:3 * N_ACTIONS] = log_var


def init_params(key):
    """Deterministic init mirroring the PyTorch module's layer shapes."""
    ks = iter(jax.random.split(key, 16))

    def w(shape, fan_in):
        return (jax.random.normal(next(ks), shape, jnp.float32)
                / jnp.sqrt(jnp.float32(fan_in)))

    def b(shape):
        return jax.random.normal(next(ks), shape, jnp.float32) * 0.01

    p = {}
    p['ws'] = w((N_STATES, HID), N_STATES);   p['bs'] = b((1, HID))      # fcs
    p['wsn'] = w((N_STATES, HID), N_STATES);  p['bsn'] = b((1, HID))     # fcs_
    p['wmi'] = w((2 * HID, HID), 2 * HID);    p['bmi'] = b((1, HID))     # mu tower
    p['wmh'] = w((3, HID, HID), HID);         p['bmh'] = b((3, 1, HID))
    p['wmo'] = w((HID, N_ACTIONS), HID);      p['bmo'] = b((1, N_ACTIONS))
    p['wli'] = w((2 * HID, HID), 2 * HID);    p['bli'] = b((1, HID))     # log_var tower
    p['wlh'] = w((3, HID, HID), HID);         p['blh'] = b((3, 1, HID))
    p['wlo'] = w((HID, N_ACTIONS), HID);      p['blo'] = b((1, N_ACTIONS))
    return p


def pack_params(p):
    """Pack the 16 PyTorch-style tensors into 6 fused slabs (bf16 weights, f32 biases)."""
    A = N_ACTIONS
    f32, bf16 = jnp.float32, jnp.bfloat16

    # block-diagonal encoder: both Linear(n_states,128) in one (16,256) dot
    w_enc = jnp.zeros((2 * N_STATES, D), f32)
    w_enc = w_enc.at[:N_STATES, :HID].set(p['ws'])
    w_enc = w_enc.at[N_STATES:, HID:].set(p['wsn'])
    b_enc = jnp.concatenate([p['bs'], p['bsn']], axis=-1)                # (1,256)

    # tower layer 0: both branches consume the full 256-wide s_cat -> column concat
    w_hid = [jnp.concatenate([p['wmi'], p['wli']], axis=1)]              # (256,256)
    b_hid = [jnp.concatenate([p['bmi'], p['bli']], axis=-1)]             # (1,256)
    for i in range(3):                                                   # block-diagonal hiddens
        w = jnp.zeros((D, D), f32)
        w = w.at[:HID, :HID].set(p['wmh'][i])
        w = w.at[HID:, HID:].set(p['wlh'][i])
        w_hid.append(w)
        b_hid.append(jnp.concatenate([p['bmh'][i], p['blh'][i]], axis=-1))
    w_tower = jnp.stack(w_hid, axis=0)                                   # (4,256,256)
    b_tower = jnp.stack(b_hid, axis=0)                                   # (4,1,256)

    # block-diagonal heads -> [mu | log_var]
    w_head = jnp.zeros((D, 2 * A), f32)
    w_head = w_head.at[:HID, :A].set(p['wmo'])
    w_head = w_head.at[HID:, A:].set(p['wlo'])
    b_head = jnp.concatenate([p['bmo'], p['blo']], axis=-1)              # (1,8)

    return dict(w_enc=w_enc.astype(bf16), b_enc=b_enc,
                w_tower=w_tower.astype(bf16), b_tower=b_tower,
                w_head=w_head.astype(bf16), b_head=b_head)


def planning_forward_batched(packed, s_batch, s_next_batch, key):
    """Evaluate many (s, s_next) pairs in one kernel call (B rows)."""
    B = s_batch.shape[0]
    A = N_ACTIONS
    x = jnp.concatenate([s_batch.astype(jnp.float32),
                         s_next_batch.astype(jnp.float32)], axis=-1)     # (B, 16)
    eps = jax.random.uniform(key, (B, A), jnp.float32)                   # torch.rand_like

    # pad batch to a multiple of 8 sublanes; block at <=256 rows per grid step
    b_pad = pl.cdiv(B, 8) * 8
    bb = b_pad if b_pad <= 256 else 256
    b_pad = pl.cdiv(b_pad, bb) * bb
    x = jnp.pad(x, ((0, b_pad - B), (0, 0)))
    eps = jnp.pad(eps, ((0, b_pad - B), (0, 0)))

    out = pl.pallas_call(
        planning_kernel,
        out_shape=jax.ShapeDtypeStruct((b_pad, 3 * A), jnp.float32),
        grid=(b_pad // bb,),
        in_specs=[
            pl.BlockSpec((bb, 2 * N_STATES), lambda i: (i, 0)),          # packed [s|s_next]
            pl.BlockSpec((bb, A), lambda i: (i, 0)),                     # eps
            pl.BlockSpec((2 * N_STATES, D), lambda i: (0, 0)),           # w_enc
            pl.BlockSpec((1, D), lambda i: (0, 0)),                      # b_enc
            pl.BlockSpec((N_TOWER_LAYERS, D, D), lambda i: (0, 0, 0)),   # w_tower
            pl.BlockSpec((N_TOWER_LAYERS, 1, D), lambda i: (0, 0, 0)),   # b_tower
            pl.BlockSpec((D, 2 * A), lambda i: (0, 0)),                  # w_head
            pl.BlockSpec((1, 2 * A), lambda i: (0, 0)),                  # b_head
        ],
        out_specs=pl.BlockSpec((bb, 3 * A), lambda i: (i, 0)),
        compiler_params=pltpu.CompilerParams(
            dimension_semantics=("parallel",)),   # batch blocks shard across TCs (v7x)
    )(x, eps, packed['w_enc'], packed['b_enc'],
      packed['w_tower'], packed['b_tower'],
      packed['w_head'], packed['b_head'])

    act = out[:B, :A]
    mu = out[:B, A:2 * A]
    log_var = out[:B, 2 * A:]
    return act, mu, log_var


def planning_forward(packed, s, s_next, key):
    """Module-semantics forward: s.float().unsqueeze(0) -> (act, mu, log_var) each (1, A)."""
    return planning_forward_batched(packed, s[None, :], s_next[None, :], key)


def planning_reference(packed, s, s_next, key):
    """Plain-JAX reference using the same packed (bf16) weights, for validation."""
    f32, bf16 = jnp.float32, jnp.bfloat16
    dot = lambda a, b: jnp.dot(a.astype(bf16), b, preferred_element_type=f32)
    x = jnp.concatenate([s.astype(f32)[None, :], s_next.astype(f32)[None, :]], axis=-1)
    eps = jax.random.uniform(key, (1, N_ACTIONS), f32)
    h = jnp.maximum(dot(x, packed['w_enc']) + packed['b_enc'], 0.0)
    for i in range(N_TOWER_LAYERS):
        y = dot(h, packed['w_tower'][i]) + packed['b_tower'][i]
        h = jnp.concatenate([jnp.tanh(y[:, :HID]), jnp.maximum(y[:, HID:], 0.0)], axis=-1)
    y = dot(h, packed['w_head']) + packed['b_head']
    mu, lv = y[:, :N_ACTIONS], y[:, N_ACTIONS:]
    act = mu + (jnp.exp(0.5 * lv) + 1e-5) * eps
    return act, mu, lv


if __name__ == "__main__":
    key = jax.random.PRNGKey(0)
    pkey, skey, snkey, ekey = jax.random.split(key, 4)

    raw = init_params(pkey)
    packed = pack_params(raw)

    s = jax.random.normal(skey, (N_STATES,), jnp.float32)
    s_next = jax.random.normal(snkey, (N_STATES,), jnp.float32)

    act, mu, log_var = planning_forward(packed, s, s_next, ekey)
    jax.block_until_ready((act, mu, log_var))

    assert act.shape == (1, N_ACTIONS)
    assert mu.shape == (1, N_ACTIONS)
    assert log_var.shape == (1, N_ACTIONS)

    act_r, mu_r, lv_r = planning_reference(packed, s, s_next, ekey)
    assert bool(jnp.allclose(mu, mu_r, atol=1e-2, rtol=1e-2))
    assert bool(jnp.allclose(log_var, lv_r, atol=1e-2, rtol=1e-2))
    assert bool(jnp.allclose(act, act_r, atol=1e-2, rtol=1e-2))

    print("KERNEL_OK")
</pallas_src>

<mosaic_0001>
module attributes {stable_mosaic.version = 11 : i64} {
  func.func @planning_kernel(%arg0: i32, %arg1: memref<8x16xf32, #tpu.memory_space<vmem>>, %arg2: memref<8x4xf32, #tpu.memory_space<vmem>>, %arg3: memref<16x256xbf16, #tpu.memory_space<vmem>>, %arg4: memref<1x256xf32, #tpu.memory_space<vmem>>, %arg5: memref<4x256x256xbf16, #tpu.memory_space<vmem>>, %arg6: memref<4x1x256xf32, #tpu.memory_space<vmem>>, %arg7: memref<256x8xbf16, #tpu.memory_space<vmem>>, %arg8: memref<1x8xf32, #tpu.memory_space<vmem>>, %arg9: memref<8x12xf32, #tpu.memory_space<vmem>>) attributes {dimension_semantics = [#tpu.dimension_semantics<parallel>], iteration_bounds = array<i64: 1>, scalar_prefetch = 0 : i64, scratch_operands = 0 : i64, tpu.core_type = #tpu.core_type<tc>, window_params = [{transform_indices = @transform_0, window_bounds = array<i64: 8, 16>}, {transform_indices = @transform_1, window_bounds = array<i64: 8, 4>}, {pipeline_mode = #tpu.pipeline_mode<synchronous>, transform_indices = @transform_2, window_bounds = array<i64: 16, 256>}, {pipeline_mode = #tpu.pipeline_mode<synchronous>, transform_indices = @transform_3, window_bounds = array<i64: 1, 256>}, {pipeline_mode = #tpu.pipeline_mode<synchronous>, transform_indices = @transform_4, window_bounds = array<i64: 4, 256, 256>}, {pipeline_mode = #tpu.pipeline_mode<synchronous>, transform_indices = @transform_5, window_bounds = array<i64: 4, 1, 256>}, {pipeline_mode = #tpu.pipeline_mode<synchronous>, transform_indices = @transform_6, window_bounds = array<i64: 256, 8>}, {pipeline_mode = #tpu.pipeline_mode<synchronous>, transform_indices = @transform_7, window_bounds = array<i64: 1, 8>}, {transform_indices = @transform_8, window_bounds = array<i64: 8, 12>}]} {
    %c0 = arith.constant 0 : index
    %c0_0 = arith.constant 0 : index
    %0 = vector.load %arg1[%c0, %c0_0] : memref<8x16xf32, #tpu.memory_space<vmem>>, vector<8x16xf32>
    %c0_1 = arith.constant 0 : index
    %c0_2 = arith.constant 0 : index
    %1 = vector.load %arg3[%c0_1, %c0_2] : memref<16x256xbf16, #tpu.memory_space<vmem>>, vector<16x256xbf16>
    %2 = arith.truncf %0 : vector<8x16xf32> to vector<8x16xbf16>
    %cst = arith.constant dense<0.000000e+00> : vector<8x256xf32>
    %3 = tpu.matmul %2, %1, %cst {dimension_numbers = #tpu.dot_dimension_numbers<[1], [0], [0], [1], [0, 0, 1, 1], [], []>} : vector<8x16xbf16>, vector<16x256xbf16>, vector<8x256xf32> -> vector<8x256xf32>
    %c0_3 = arith.constant 0 : index
    %c0_4 = arith.constant 0 : index
    %4 = vector.load %arg4[%c0_3, %c0_4] : memref<1x256xf32, #tpu.memory_space<vmem>>, vector<1x256xf32>
    %5 = vector.broadcast %4 : vector<1x256xf32> to vector<8x256xf32>
    %6 = arith.addf %3, %5 : vector<8x256xf32>
    %cst_5 = arith.constant 0.000000e+00 : f32
    %7 = vector.broadcast %cst_5 : f32 to vector<8x256xf32>
    %8 = arith.maximumf %6, %7 : vector<8x256xf32>
    %9 = tpu.iota {dimensions = array<i32: 1>} : vector<8x256xi32>
    %c128_i32 = arith.constant 128 : i32
    %10 = vector.broadcast %c128_i32 : i32 to vector<8x256xi32>
    %11 = arith.cmpi slt, %9, %10 : vector<8x256xi32>
    %c0_6 = arith.constant 0 : index
    %c0_7 = arith.constant 0 : index
    %c0_8 = arith.constant 0 : index
    %12 = vector.load %arg5[%c0_6, %c0_7, %c0_8] : memref<4x256x256xbf16, #tpu.memory_space<vmem>>, vector<1x256x256xbf16>
    %13 = vector.shape_cast %12 : vector<1x256x256xbf16> to vector<256x256xbf16>
    %14 = arith.truncf %8 : vector<8x256xf32> to vector<8x256xbf16>
    %cst_9 = arith.constant dense<0.000000e+00> : vector<8x256xf32>
    %15 = tpu.matmul %14, %13, %cst_9 {dimension_numbers = #tpu.dot_dimension_numbers<[1], [0], [0], [1], [0, 0, 1, 1], [], []>} : vector<8x256xbf16>, vector<256x256xbf16>, vector<8x256xf32> -> vector<8x256xf32>
    %c0_10 = arith.constant 0 : index
    %c0_11 = arith.constant 0 : index
    %c0_12 = arith.constant 0 : index
    %16 = vector.load %arg6[%c0_10, %c0_11, %c0_12] : memref<4x1x256xf32, #tpu.memory_space<vmem>>, vector<1x1x256xf32>
    %17 = vector.shape_cast %16 : vector<1x1x256xf32> to vector<1x256xf32>
    %18 = vector.broadcast %17 : vector<1x256xf32> to vector<8x256xf32>
    %19 = arith.addf %15, %18 : vector<8x256xf32>
    %20 = math.tanh %19 : vector<8x256xf32>
    %cst_13 = arith.constant 0.000000e+00 : f32
    %21 = vector.broadcast %cst_13 : f32 to vector<8x256xf32>
    %22 = arith.maximumf %19, %21 : vector<8x256xf32>
    %23 = arith.select %11, %20, %22 : vector<8x256xi1>, vector<8x256xf32>
    %c1 = arith.constant 1 : index
    %c0_14 = arith.constant 0 : index
    %c0_15 = arith.constant 0 : index
    %24 = vector.load %arg5[%c1, %c0_14, %c0_15] : memref<4x256x256xbf16, #tpu.memory_space<vmem>>, vector<1x256x256xbf16>
    %25 = vector.shape_cast %24 : vector<1x256x256xbf16> to vector<256x256xbf16>
    %26 = arith.truncf %23 : vector<8x256xf32> to vector<8x256xbf16>
    %cst_16 = arith.constant dense<0.000000e+00> : vector<8x256xf32>
    %27 = tpu.matmul %26, %25, %cst_16 {dimension_numbers = #tpu.dot_dimension_numbers<[1], [0], [0], [1], [0, 0, 1, 1], [], []>} : vector<8x256xbf16>, vector<256x256xbf16>, vector<8x256xf32> -> vector<8x256xf32>
    %c1_17 = arith.constant 1 : index
    %c0_18 = arith.constant 0 : index
    %c0_19 = arith.constant 0 : index
    %28 = vector.load %arg6[%c1_17, %c0_18, %c0_19] : memref<4x1x256xf32, #tpu.memory_space<vmem>>, vector<1x1x256xf32>
    %29 = vector.shape_cast %28 : vector<1x1x256xf32> to vector<1x256xf32>
    %30 = vector.broadcast %29 : vector<1x256xf32> to vector<8x256xf32>
    %31 = arith.addf %27, %30 : vector<8x256xf32>
    %32 = math.tanh %31 : vector<8x256xf32>
    %cst_20 = arith.constant 0.000000e+00 : f32
    %33 = vector.broadcast %cst_20 : f32 to vector<8x256xf32>
    %34 = arith.maximumf %31, %33 : vector<8x256xf32>
    %35 = arith.select %11, %32, %34 : vector<8x256xi1>, vector<8x256xf32>
    %c2 = arith.constant 2 : index
    %c0_21 = arith.constant 0 : index
    %c0_22 = arith.constant 0 : index
    %36 = vector.load %arg5[%c2, %c0_21, %c0_22] : memref<4x256x256xbf16, #tpu.memory_space<vmem>>, vector<1x256x256xbf16>
    %37 = vector.shape_cast %36 : vector<1x256x256xbf16> to vector<256x256xbf16>
    %38 = arith.truncf %35 : vector<8x256xf32> to vector<8x256xbf16>
    %cst_23 = arith.constant dense<0.000000e+00> : vector<8x256xf32>
    %39 = tpu.matmul %38, %37, %cst_23 {dimension_numbers = #tpu.dot_dimension_numbers<[1], [0], [0], [1], [0, 0, 1, 1], [], []>} : vector<8x256xbf16>, vector<256x256xbf16>, vector<8x256xf32> -> vector<8x256xf32>
    %c2_24 = arith.constant 2 : index
    %c0_25 = arith.constant 0 : index
    %c0_26 = arith.constant 0 : index
    %40 = vector.load %arg6[%c2_24, %c0_25, %c0_26] : memref<4x1x256xf32, #tpu.memory_space<vmem>>, vector<1x1x256xf32>
    %41 = vector.shape_cast %40 : vector<1x1x256xf32> to vector<1x256xf32>
    %42 = vector.broadcast %41 : vector<1x256xf32> to vector<8x256xf32>
    %43 = arith.addf %39, %42 : vector<8x256xf32>
    %44 = math.tanh %43 : vector<8x256xf32>
    %cst_27 = arith.constant 0.000000e+00 : f32
    %45 = vector.broadcast %cst_27 : f32 to vector<8x256xf32>
    %46 = arith.maximumf %43, %45 : vector<8x256xf32>
    %47 = arith.select %11, %44, %46 : vector<8x256xi1>, vector<8x256xf32>
    %c3 = arith.constant 3 : index
    %c0_28 = arith.constant 0 : index
    %c0_29 = arith.constant 0 : index
    %48 = vector.load %arg5[%c3, %c0_28, %c0_29] : memref<4x256x256xbf16, #tpu.memory_space<vmem>>, vector<1x256x256xbf16>
    %49 = vector.shape_cast %48 : vector<1x256x256xbf16> to vector<256x256xbf16>
    %50 = arith.truncf %47 : vector<8x256xf32> to vector<8x256xbf16>
    %cst_30 = arith.constant dense<0.000000e+00> : vector<8x256xf32>
    %51 = tpu.matmul %50, %49, %cst_30 {dimension_numbers = #tpu.dot_dimension_numbers<[1], [0], [0], [1], [0, 0, 1, 1], [], []>} : vector<8x256xbf16>, vector<256x256xbf16>, vector<8x256xf32> -> vector<8x256xf32>
    %c3_31 = arith.constant 3 : index
    %c0_32 = arith.constant 0 : index
    %c0_33 = arith.constant 0 : index
    %52 = vector.load %arg6[%c3_31, %c0_32, %c0_33] : memref<4x1x256xf32, #tpu.memory_space<vmem>>, vector<1x1x256xf32>
    %53 = vector.shape_cast %52 : vector<1x1x256xf32> to vector<1x256xf32>
    %54 = vector.broadcast %53 : vector<1x256xf32> to vector<8x256xf32>
    %55 = arith.addf %51, %54 : vector<8x256xf32>
    %56 = math.tanh %55 : vector<8x256xf32>
    %cst_34 = arith.constant 0.000000e+00 : f32
    %57 = vector.broadcast %cst_34 : f32 to vector<8x256xf32>
    %58 = arith.maximumf %55, %57 : vector<8x256xf32>
    %59 = arith.select %11, %56, %58 : vector<8x256xi1>, vector<8x256xf32>
    %c0_35 = arith.constant 0 : index
    %c0_36 = arith.constant 0 : index
    %60 = vector.load %arg7[%c0_35, %c0_36] : memref<256x8xbf16, #tpu.memory_space<vmem>>, vector<256x8xbf16>
    %61 = arith.truncf %59 : vector<8x256xf32> to vector<8x256xbf16>
    %cst_37 = arith.constant dense<0.000000e+00> : vector<8x8xf32>
    %62 = tpu.matmul %61, %60, %cst_37 {dimension_numbers = #tpu.dot_dimension_numbers<[1], [0], [0], [1], [0, 0, 1, 1], [], []>} : vector<8x256xbf16>, vector<256x8xbf16>, vector<8x8xf32> -> vector<8x8xf32>
    %c0_38 = arith.constant 0 : index
    %c0_39 = arith.constant 0 : index
    %63 = vector.load %arg8[%c0_38, %c0_39] : memref<1x8xf32, #tpu.memory_space<vmem>>, vector<1x8xf32>
    %64 = vector.broadcast %63 : vector<1x8xf32> to vector<8x8xf32>
    %65 = arith.addf %62, %64 : vector<8x8xf32>
    %66 = vector.extract_strided_slice %65 {offsets = [0, 0], sizes = [8, 4], strides = [1, 1]} : vector<8x8xf32> to vector<8x4xf32>
    %67 = vector.extract_strided_slice %65 {offsets = [0, 4], sizes = [8, 4], strides = [1, 1]} : vector<8x8xf32> to vector<8x4xf32>
    %cst_40 = arith.constant 5.000000e-01 : f32
    %68 = vector.broadcast %cst_40 : f32 to vector<8x4xf32>
    %69 = arith.mulf %68, %67 : vector<8x4xf32>
    %70 = math.exp %69 : vector<8x4xf32>
    %cst_41 = arith.constant 9.99999974E-6 : f32
    %71 = vector.broadcast %cst_41 : f32 to vector<8x4xf32>
    %72 = arith.addf %70, %71 : vector<8x4xf32>
    %c0_42 = arith.constant 0 : index
    %c0_43 = arith.constant 0 : index
    %73 = vector.load %arg2[%c0_42, %c0_43] : memref<8x4xf32, #tpu.memory_space<vmem>>, vector<8x4xf32>
    %74 = arith.mulf %72, %73 : vector<8x4xf32>
    %75 = arith.addf %66, %74 : vector<8x4xf32>
    %c0_44 = arith.constant 0 : index
    %c0_45 = arith.constant 0 : index
    %76 = vector.load %arg9[%c0_44, %c0_45] : memref<8x12xf32, #tpu.memory_space<vmem>>, vector<8x4xf32>
    tpu.vector_store %arg9[%c0_44, %c0_45], %75 {strides = array<i32>} : memref<8x12xf32, #tpu.memory_space<vmem>>, vector<8x4xf32>,
    %c0_46 = arith.constant 0 : index
    %c4 = arith.constant 4 : index
    %77 = vector.load %arg9[%c0_46, %c4] : memref<8x12xf32, #tpu.memory_space<vmem>>, vector<8x4xf32>
    tpu.vector_store %arg9[%c0_46, %c4], %66 {strides = array<i32>} : memref<8x12xf32, #tpu.memory_space<vmem>>, vector<8x4xf32>,
    %c0_47 = arith.constant 0 : index
    %c8 = arith.constant 8 : index
    %78 = vector.load %arg9[%c0_47, %c8] : memref<8x12xf32, #tpu.memory_space<vmem>>, vector<8x4xf32>
    tpu.vector_store %arg9[%c0_47, %c8], %67 {strides = array<i32>} : memref<8x12xf32, #tpu.memory_space<vmem>>, vector<8x4xf32>,
    return
  }
  func.func @transform_0(%arg0: i32) -> (i32, i32) {
    %c0_i32 = arith.constant 0 : i32
    %c0_i32_0 = arith.constant 0 : i32
    return %arg0, %c0_i32 : i32, i32
  }
  func.func @transform_1(%arg0: i32) -> (i32, i32) {
    %c0_i32 = arith.constant 0 : i32
    %c0_i32_0 = arith.constant 0 : i32
    return %arg0, %c0_i32 : i32, i32
  }
  func.func @transform_2(%arg0: i32) -> (i32, i32) {
    %c0_i32 = arith.constant 0 : i32
    %c0_i32_0 = arith.constant 0 : i32
    %c0_i32_1 = arith.constant 0 : i32
    return %c0_i32, %c0_i32_0 : i32, i32
  }
  func.func @transform_3(%arg0: i32) -> (i32, i32) {
    %c0_i32 = arith.constant 0 : i32
    %c0_i32_0 = arith.constant 0 : i32
    %c0_i32_1 = arith.constant 0 : i32
    return %c0_i32, %c0_i32_0 : i32, i32
  }
  func.func @transform_4(%arg0: i32) -> (i32, i32, i32) {
    %c0_i32 = arith.constant 0 : i32
    %c0_i32_0 = arith.constant 0 : i32
    %c0_i32_1 = arith.constant 0 : i32
    %c0_i32_2 = arith.constant 0 : i32
    return %c0_i32, %c0_i32_0, %c0_i32_1 : i32, i32, i32
  }
  func.func @transform_5(%arg0: i32) -> (i32, i32, i32) {
    %c0_i32 = arith.constant 0 : i32
    %c0_i32_0 = arith.constant 0 : i32
    %c0_i32_1 = arith.constant 0 : i32
    %c0_i32_2 = arith.constant 0 : i32
    return %c0_i32, %c0_i32_0, %c0_i32_1 : i32, i32, i32
  }
  func.func @transform_6(%arg0: i32) -> (i32, i32) {
    %c0_i32 = arith.constant 0 : i32
    %c0_i32_0 = arith.constant 0 : i32
    %c0_i32_1 = arith.constant 0 : i32
    return %c0_i32, %c0_i32_0 : i32, i32
  }
  func.func @transform_7(%arg0: i32) -> (i32, i32) {
    %c0_i32 = arith.constant 0 : i32
    %c0_i32_0 = arith.constant 0 : i32
    %c0_i32_1 = arith.constant 0 : i32
    return %c0_i32, %c0_i32_0 : i32, i32
  }
  func.func @transform_8(%arg0: i32) -> (i32, i32) {
    %c0_i32 = arith.constant 0 : i32
    %c0_i32_0 = arith.constant 0 : i32
    return %arg0, %c0_i32 : i32, i32
  }
}

</mosaic_0001>

<bundles_post_ra>
// kernel: tpu_custom_call.1
= control target key start
LH: loop header
LB: loop body
LE: loop exit
PB: predicated region body
PF: predicated region fallthrough
CT: control target
= control target key end

     0   :  { %13 = vsyncpa [#allocation3], 0  ;;  %s1975_s0 = inlined_call_operand.vmem [shape: f32[8,16], index: 0, kind: input, shape index: {}]   ;;  %s1976_s1 = inlined_call_operand.vmem [shape: f32[8,4], index: 1, kind: input, shape index: {}]   ;;  %s1977_s2 = inlined_call_operand.vmem [shape: bf16[16,256], index: 2, kind: input, shape index: {}]   ;;  %s1978_s3 = inlined_call_operand.vmem [shape: f32[1,256], index: 3, kind: input, shape index: {}]   ;;  %s1979_s4 = inlined_call_operand.hbm [shape: bf16[4,256,256], index: 4, kind: input, shape index: {}]   ;;  %s1980_s5 = inlined_call_operand.vmem [shape: f32[4,1,256], index: 5, kind: input, shape index: {}]   ;;  %s1981_s6 = inlined_call_operand.vmem [shape: bf16[256,8], index: 6, kind: input, shape index: {}]   ;;  %s1982_s7 = inlined_call_operand.vmem [shape: f32[1,8], index: 7, kind: input, shape index: {}]   ;;  %s1983_s8 = inlined_call_operand.hbm [shape: f32[8,12], index: 8, kind: output, shape index: {}]  }
   0x1   :  { %14 = vsyncpa [#allocation4], 0  ;;  %s1807_s27 = smov [#allocation2]   ;;  %s1759_s9 = scalar_lea.hbm %s1979_s4, 16384 }
   0x2   :  { %s28_s28 = sshll.u32 %s1807_s27, 4  ;;  %p1760_p0 = scmp.ne.s32.totalorder %s1979_s4, %s1759_s9  ;;  %s29_s28 = int_to_ptr.vmem [resolvable:$true] %s28_s28 }
   0x3   :  { %p1763_p1 = scmp.lt.u32.totalorder %s1759_s9, %s1979_s4 }
   0x5   :  { %p1765_p2 = pnand %p1763_p1, %p1760_p0 }
   0x7   :  { %1768 = shalt.err (!%p1765_p2)
}
   0x8   :  { %s1769_s14 = scalar_lea.vmem %s29_s28, 16384  ;;  %p1774_p4 = scmp.lt.s32.totalorder %s29_s28, %s29_s28 }
   0x9   :  { %p1770_p3 = scmp.ne.s32.totalorder %s29_s28, %s1769_s14  ;;  %p1775_p5 = scmp.lt.s32.totalorder %s1769_s14, %s1769_s14 }
   0xb   :  { %p1776_p6 = por %p1775_p5, %p1774_p4 }
   0xd   :  { %p1777_p7 = pnand %p1776_p6, %p1770_p3 }
   0xf   :  { %1780 = shalt.err (!%p1777_p7)
}
  0x10   :  { %s1808_s15 = smov 128   ;;  %s1809_s16 = smov 8  }
  0x11   :  { %34 = dma.hbm_to_vmem [thread:$0]  %s1979_s4, 16384, %s29_s28, [#allocation3], %s1808_s15, %s1808_s15, %s1809_s16  }
  0x12   :  { %1803 = dma.done.wait [#allocation3], 16384  }
  0x13   :  { %1804 = vsyncadd [#allocation3], 4294950912  ;;  %v1810_v0 = vmov 0   ;;  %v1538_v1 = vld [vmem:[%s1977_s2 + $0x4] ss:$8 sps:$4 sm:$0xff]   ;;  %vm71_vm0 = vcmask 130048   ;;  %v51_v61 = vlaneseq }
  0x14   :  { %107 = vmatprep.mubr.bf16.mxu0 %v1810_v0  ;;  %v1540_v2 = vld [vmem:[%s1977_s2] ss:$8 sps:$4 sm:$0xff]   ;;  %75 = vmatprep.subr.bf16.mxu0 %v1538_v1  ;;  %v1541_v5 = vld [vmem:[#allocation2 + $0x4] ss:$8 sps:$4 sm:$0xff]   ;;  %v1544_v7 = vld [vmem:[#allocation2 + $0x14] ss:$8 sps:$4 sm:$0xff]  }
  0x15   :  { %v45_v3 = vld [vmem:[%s1975_s0] sm:$0xff]  ;;  %76 = vmatpush1.bf16.msra.mxu0 %v1540_v2  ;;  %329 = vmatprep.subr.bf16.mxu1 %v1541_v5  ;;  %v1546_v8 = vld [vmem:[#allocation2 + $0x10] ss:$8 sps:$4 sm:$0xff]   ;;  %v1550_v11 = vld [vmem:[#allocation2 + $0x34] ss:$8 sps:$4 sm:$0xff]   ;;  %v52_v62 = vshrl.u32 %v51_v61, 7 }
  0x16   :  { %v48_v4 = vpack.c.bf16 %v45_v3, %v45_v3  ;;  %v1543_v6 = vld [vmem:[#allocation2] ss:$8 sps:$4 sm:$0xff]   ;;  %v1547_v9 = vld [vmem:[#allocation2 + $0x24] ss:$8 sps:$4 sm:$0xff]   ;;  %v1552_v12 = vld [vmem:[#allocation2 + $0x30] ss:$8 sps:$4 sm:$0xff]  }
  0x17   :  { %330 = vmatpush1.bf16.msra.mxu1 %v1543_v6  ;;  %v1549_v10 = vld [vmem:[#allocation2 + $0x20] ss:$8 sps:$4 sm:$0xff]   ;;  %v1553_v13 = vld [vmem:[#allocation2 + $0x44] ss:$8 sps:$4 sm:$0xff]   ;;  %v1556_v15 = vld [vmem:[#allocation2 + $0x54] ss:$8 sps:$4 sm:$0xff]  }
  0x18   :  { %1360 = vmatmul.mubr.msk.bf16.vlgmr.msra.gmra.mrb[0].mxu0 %vm71_vm0, %v48_v4  ;;  %331 = vmatprep.subr.bf16.mxu1 %v1544_v7  ;;  %v1555_v14 = vld [vmem:[#allocation2 + $0x40] ss:$8 sps:$4 sm:$0xff]   ;;  %v1558_v16 = vld [vmem:[#allocation2 + $0x50] ss:$8 sps:$4 sm:$0xff]   ;;  %v1559_v17 = vld [vmem:[#allocation2 + $0x64] ss:$8 sps:$4 sm:$0xff]  }
  0x19   :  { %v1561_v18 = vld [vmem:[#allocation2 + $0x60] ss:$8 sps:$4 sm:$0xff]   ;;  %v1562_v19 = vld [vmem:[#allocation2 + $0x74] ss:$8 sps:$4 sm:$0xff]   ;;  %v1564_v20 = vld [vmem:[#allocation2 + $0x70] ss:$8 sps:$4 sm:$0xff]  }
  0x1a   :  { %v1565_v21 = vld [vmem:[#allocation2 + $0x84] ss:$8 sps:$4 sm:$0xff]   ;;  %v1567_v22 = vld [vmem:[#allocation2 + $0x80] ss:$8 sps:$4 sm:$0xff]   ;;  %v1568_v23 = vld [vmem:[#allocation2 + $0x94] ss:$8 sps:$4 sm:$0xff]  }
  0x1b   :  { %332 = vmatpush1.bf16.msra.mxu1 %v1546_v8  ;;  %v1570_v24 = vld [vmem:[#allocation2 + $0x90] ss:$8 sps:$4 sm:$0xff]   ;;  %v1571_v25 = vld [vmem:[#allocation2 + $0xa4] ss:$8 sps:$4 sm:$0xff]   ;;  %v1573_v26 = vld [vmem:[#allocation2 + $0xa0] ss:$8 sps:$4 sm:$0xff]  }
  0x1c   :  { %333 = vmatprep.subr.bf16.mxu1 %v1547_v9  ;;  %v1574_v27 = vld [vmem:[#allocation2 + $0xb4] ss:$8 sps:$4 sm:$0xff]   ;;  %v1576_v28 = vld [vmem:[#allocation2 + $0xb0] ss:$8 sps:$4 sm:$0xff]   ;;  %v1577_v29 = vld [vmem:[#allocation2 + $0xc4] ss:$8 sps:$4 sm:$0xff]  }
  0x1d   :  { %v1579_v30 = vld [vmem:[#allocation2 + $0xc0] ss:$8 sps:$4 sm:$0xff]   ;;  %v1580_v31 = vld [vmem:[#allocation2 + $0xd4] ss:$8 sps:$4 sm:$0xff]   ;;  %v1582_v32 = vld [vmem:[#allocation2 + $0xd0] ss:$8 sps:$4 sm:$0xff]  }
  0x1e   :  { %v1583_v33 = vld [vmem:[#allocation2 + $0xe4] ss:$8 sps:$4 sm:$0xff]   ;;  %v1585_v34 = vld [vmem:[#allocation2 + $0xe0] ss:$8 sps:$4 sm:$0xff]   ;;  %v1586_v35 = vld [vmem:[#allocation2 + $0xf4] ss:$8 sps:$4 sm:$0xff]  }
  0x1f   :  { %334 = vmatpush1.bf16.msra.mxu1 %v1549_v10  ;;  %v1588_v36 = vld [vmem:[#allocation2 + $0xf0] ss:$8 sps:$4 sm:$0xff]   ;;  %v1589_v37 = vld [vmem:[#allocation2 + $0x100] ss:$8 sps:$4 sm:$0xff]   ;;  %v1591_v38 = vld [vmem:[#allocation2 + $0x104] ss:$8 sps:$4 sm:$0xff]  }
  0x20   :  { %335 = vmatprep.subr.bf16.mxu1 %v1550_v11  ;;  %v1594_v39 = vld [vmem:[#allocation2 + $0x114] ss:$8 sps:$4 sm:$0xff]   ;;  %584 = vmatprep.subr.bf16.mxu0 %v1591_v38  ;;  %v1592_v40 = vld [vmem:[#allocation2 + $0x110] ss:$8 sps:$4 sm:$0xff]   ;;  %v1597_v41 = vld [vmem:[#allocation2 + $0x124] ss:$8 sps:$4 sm:$0xff]  }
  0x21   :  { %585 = vmatpush1.bf16.msra.mxu0 %v1589_v37  ;;  %v1595_v42 = vld [vmem:[#allocation2 + $0x120] ss:$8 sps:$4 sm:$0xff]   ;;  %v1600_v43 = vld [vmem:[#allocation2 + $0x134] ss:$8 sps:$4 sm:$0xff]   ;;  %v1598_v44 = vld [vmem:[#allocation2 + $0x130] ss:$8 sps:$4 sm:$0xff]  }
  0x22   :  { %586 = vmatprep.subr.bf16.mxu0 %v1594_v39  ;;  %v1603_v45 = vld [vmem:[#allocation2 + $0x144] ss:$8 sps:$4 sm:$0xff]   ;;  %v1601_v46 = vld [vmem:[#allocation2 + $0x140] ss:$8 sps:$4 sm:$0xff]   ;;  %v1606_v47 = vld [vmem:[#allocation2 + $0x154] ss:$8 sps:$4 sm:$0xff]  }
  0x23   :  { %336 = vmatpush1.bf16.msra.mxu1 %v1552_v12  ;;  %v1604_v48 = vld [vmem:[#allocation2 + $0x150] ss:$8 sps:$4 sm:$0xff]   ;;  %v1609_v49 = vld [vmem:[#allocation2 + $0x164] ss:$8 sps:$4 sm:$0xff]   ;;  %v1607_v50 = vld [vmem:[#allocation2 + $0x160] ss:$8 sps:$4 sm:$0xff]  }
  0x24   :  { %337 = vmatprep.subr.bf16.mxu1 %v1553_v13  ;;  %v1612_v51 = vld [vmem:[#allocation2 + $0x174] ss:$8 sps:$4 sm:$0xff]   ;;  %v1610_v52 = vld [vmem:[#allocation2 + $0x170] ss:$8 sps:$4 sm:$0xff]   ;;  %v1615_v53 = vld [vmem:[#allocation2 + $0x184] ss:$8 sps:$4 sm:$0xff]  }
  0x25   :  { %587 = vmatpush1.bf16.msra.mxu0 %v1592_v40  ;;  %v1613_v54 = vld [vmem:[#allocation2 + $0x180] ss:$8 sps:$4 sm:$0xff]   ;;  %v1618_v55 = vld [vmem:[#allocation2 + $0x194] ss:$8 sps:$4 sm:$0xff]   ;;  %v1616_v56 = vld [vmem:[#allocation2 + $0x190] ss:$8 sps:$4 sm:$0xff]  }
  0x26   :  { %588 = vmatprep.subr.bf16.mxu0 %v1597_v41  ;;  %v1621_v57 = vld [vmem:[#allocation2 + $0x1a4] ss:$8 sps:$4 sm:$0xff]   ;;  %v1619_v58 = vld [vmem:[#allocation2 + $0x1a0] ss:$8 sps:$4 sm:$0xff]   ;;  %v1624_v59 = vld [vmem:[#allocation2 + $0x1b4] ss:$8 sps:$4 sm:$0xff]  }
  0x27   :  { %338 = vmatpush1.bf16.msra.mxu1 %v1555_v14  ;;  %v1622_v60 = vld [vmem:[#allocation2 + $0x1b0] ss:$8 sps:$4 sm:$0xff]   ;;  %v1880_v63 = vsub.s32 0, %v52_v62  ;;  %v49_v0 = vld [vmem:[%s1978_s3] sm:$0x3]  ;;  %v1885_v1 = vsub.s32 1, %v52_v62 }
  0x28   :  { %339 = vmatprep.subr.bf16.mxu1 %v1556_v15  ;;  %v1627_v14 = vld [vmem:[#allocation2 + $0x1c4] ss:$8 sps:$4 sm:$0xff]   ;;  %v1625_v15 = vld [vmem:[#allocation2 + $0x1c0] ss:$8 sps:$4 sm:$0xff]   ;;  %v1658_v37 = vld [vmem:[#allocation2 + $0x270] ss:$8 sps:$4 sm:$0xff]  }
  0x29   :  { %589 = vmatpush1.bf16.msra.mxu0 %v1595_v42  ;;  %v54_v2 = vrot.slane %v49_v0, %v1880_v63  ;;  %v58_v3 = vrot.slane %v49_v0, %v1885_v1  ;;  %v1663_v38 = vld [vmem:[#allocation2 + $0x284] ss:$8 sps:$4 sm:$0xff]   ;;  %v1661_v39 = vld [vmem:[#allocation2 + $0x280] ss:$8 sps:$4 sm:$0xff]   ;;  %v1666_v40 = vld [vmem:[#allocation2 + $0x294] ss:$8 sps:$4 sm:$0xff]  }
  0x2a   :  { %590 = vmatprep.subr.bf16.mxu0 %v1600_v43  ;;  %v1664_v41 = vld [vmem:[#allocation2 + $0x290] ss:$8 sps:$4 sm:$0xff]   ;;  %v1669_v42 = vld [vmem:[#allocation2 + $0x2a4] ss:$8 sps:$4 sm:$0xff]   ;;  %v1667_v43 = vld [vmem:[#allocation2 + $0x2a0] ss:$8 sps:$4 sm:$0xff]  }
  0x2b   :  { %340 = vmatpush1.bf16.msra.mxu1 %v1558_v16  ;;  %v1630_v16 = vld [vmem:[#allocation2 + $0x1d4] ss:$8 sps:$4 sm:$0xff]   ;;  %v1676_v62 = vld [vmem:[#allocation2 + $0x2d0] ss:$8 sps:$4 sm:$0xff]   ;;  %v1681_v0 = vld [vmem:[#allocation2 + $0x2e4] ss:$8 sps:$4 sm:$0xff]  }
  0x2c   :  { %341 = vmatprep.subr.bf16.mxu1 %v1559_v17  ;;  %v1628_v17 = vld [vmem:[#allocation2 + $0x1d0] ss:$8 sps:$4 sm:$0xff]   ;;  %v1678_v61 = vld [vmem:[#allocation2 + $0x2d4] ss:$8 sps:$4 sm:$0xff]   ;;  %s1811_s15 = smov 4   ;;  %vm1333_vm1 = vcmask 31744  }
  0x2d   :  { %591 = vmatpush1.bf16.msra.mxu0 %v1598_v44  ;;  %v1672_v44 = vld [vmem:[#allocation2 + $0x2b4] ss:$8 sps:$4 sm:$0xff]   ;;  %s1813_s18 = smov [#allocation5]   ;;  %vm1339_vm2 = vcmask 64544   ;;  %vm1341_vm3 = vcmask 97344  }
  0x2e   :  { %592 = vmatprep.subr.bf16.mxu0 %v1603_v45  ;;  %v1670_v45 = vld [vmem:[#allocation2 + $0x2b0] ss:$8 sps:$4 sm:$0xff]   ;;  %s1349_s19 = sshll.u32 %s1813_s18, 4  ;;  %s1350_s19 = int_to_ptr.vmem [resolvable:$true] %s1349_s19 }
  0x2f   :  { %342 = vmatpush1.bf16.msra.mxu1 %v1561_v18  ;;  %v1633_v18 = vld [vmem:[#allocation2 + $0x1e4] ss:$8 sps:$4 sm:$0xff]   ;;  %p1786_p9 = scmp.lt.s32.totalorder %s1350_s19, %s1350_s19 }
  0x30   :  { %343 = vmatprep.subr.bf16.mxu1 %v1562_v19  ;;  %v1631_v19 = vld [vmem:[#allocation2 + $0x1e0] ss:$8 sps:$4 sm:$0xff]  }
  0x31   :  { %593 = vmatpush1.bf16.msra.mxu0 %v1601_v46  ;;  %v157_v46 = vld [vmem:[%s1980_s5] sm:$0x3] }
  0x32   :  { %594 = vmatprep.subr.bf16.mxu0 %v1606_v47  ;;  %v162_v47 = vrot.slane %v157_v46, %v1880_v63 }
  0x33   :  { %344 = vmatpush1.bf16.msra.mxu1 %v1564_v20  ;;  %v1636_v20 = vld [vmem:[#allocation2 + $0x1f4] ss:$8 sps:$4 sm:$0xff]  }
  0x34   :  { %345 = vmatprep.subr.bf16.mxu1 %v1565_v21  ;;  %v1634_v21 = vld [vmem:[#allocation2 + $0x1f0] ss:$8 sps:$4 sm:$0xff]  }
  0x35   :  { %595 = vmatpush1.bf16.msra.mxu0 %v1604_v48  ;;  %v166_v48 = vrot.slane %v157_v46, %v1885_v1  ;;  %v1729_v46 = vld [vmem:[#allocation2 + $0x3e4] ss:$8 sps:$4 sm:$0xff]  }
  0x36   :  { %596 = vmatprep.subr.bf16.mxu0 %v1609_v49 }
  0x37   :  { %346 = vmatpush1.bf16.msra.mxu1 %v1567_v22  ;;  %v1637_v22 = vld [vmem:[#allocation2 + $0x200] ss:$8 sps:$4 sm:$0xff]  }
  0x38   :  { %347 = vmatprep.subr.bf16.mxu1 %v1568_v23  ;;  %v1639_v23 = vld [vmem:[#allocation2 + $0x204] ss:$8 sps:$4 sm:$0xff]  }
  0x39   :  { %597 = vmatpush1.bf16.msra.mxu0 %v1607_v50 }
  0x3a   :  { %598 = vmatprep.subr.bf16.mxu0 %v1612_v51 }
  0x3b   :  { %348 = vmatpush1.bf16.msra.mxu1 %v1570_v24  ;;  %v1642_v24 = vld [vmem:[#allocation2 + $0x214] ss:$8 sps:$4 sm:$0xff]  }
  0x3c   :  { %349 = vmatprep.subr.bf16.mxu1 %v1571_v25  ;;  %v1640_v25 = vld [vmem:[#allocation2 + $0x210] ss:$8 sps:$4 sm:$0xff]  }
  0x3d   :  { %599 = vmatpush1.bf16.msra.mxu0 %v1610_v52 }
  0x3e   :  { %600 = vmatprep.subr.bf16.mxu0 %v1615_v53 }
  0x3f   :  { %350 = vmatpush1.bf16.msra.mxu1 %v1573_v26  ;;  %v1645_v26 = vld [vmem:[#allocation2 + $0x224] ss:$8 sps:$4 sm:$0xff]  }
  0x40   :  { %351 = vmatprep.subr.bf16.mxu1 %v1574_v27  ;;  %v1643_v27 = vld [vmem:[#allocation2 + $0x220] ss:$8 sps:$4 sm:$0xff]  }
  0x41   :  { %601 = vmatpush1.bf16.msra.mxu0 %v1613_v54 }
  0x42   :  { %602 = vmatprep.subr.bf16.mxu0 %v1618_v55 }
  0x43   :  { %352 = vmatpush1.bf16.msra.mxu1 %v1576_v28  ;;  %v1648_v28 = vld [vmem:[#allocation2 + $0x234] ss:$8 sps:$4 sm:$0xff]  }
  0x44   :  { %353 = vmatprep.subr.bf16.mxu1 %v1577_v29  ;;  %v1646_v29 = vld [vmem:[#allocation2 + $0x230] ss:$8 sps:$4 sm:$0xff]  }
  0x45   :  { %603 = vmatpush1.bf16.msra.mxu0 %v1616_v56 }
  0x46   :  { %604 = vmatprep.subr.bf16.mxu0 %v1621_v57 }
  0x47   :  { %354 = vmatpush1.bf16.msra.mxu1 %v1579_v30  ;;  %v1651_v30 = vld [vmem:[#allocation2 + $0x244] ss:$8 sps:$4 sm:$0xff]  }
  0x48   :  { %355 = vmatprep.subr.bf16.mxu1 %v1580_v31  ;;  %v1649_v31 = vld [vmem:[#allocation2 + $0x240] ss:$8 sps:$4 sm:$0xff]  }
  0x49   :  { %605 = vmatpush1.bf16.msra.mxu0 %v1619_v58 }
  0x4a   :  { %606 = vmatprep.subr.bf16.mxu0 %v1624_v59  ;;  %v1675_v59 = vld [vmem:[#allocation2 + $0x2c4] ss:$8 sps:$4 sm:$0xff]  }
  0x4b   :  { %356 = vmatpush1.bf16.msra.mxu1 %v1582_v32  ;;  %v1654_v32 = vld [vmem:[#allocation2 + $0x254] ss:$8 sps:$4 sm:$0xff]  }
  0x4c   :  { %357 = vmatprep.subr.bf16.mxu1 %v1583_v33  ;;  %v1652_v33 = vld [vmem:[#allocation2 + $0x250] ss:$8 sps:$4 sm:$0xff]  }
  0x4d   :  { %607 = vmatpush1.bf16.msra.mxu0 %v1622_v60  ;;  %v1673_v60 = vld [vmem:[#allocation2 + $0x2c0] ss:$8 sps:$4 sm:$0xff]  }
  0x4e   :  { %608 = vmatprep.subr.bf16.mxu0 %v1627_v14  ;;  %v1697_v14 = vld [vmem:[#allocation2 + $0x340] ss:$8 sps:$4 sm:$0xff]  }
  0x4f   :  { %358 = vmatpush1.bf16.msra.mxu1 %v1585_v34  ;;  %v1657_v34 = vld [vmem:[#allocation2 + $0x264] ss:$8 sps:$4 sm:$0xff]  }
  0x50   :  { %359 = vmatprep.subr.bf16.mxu1 %v1586_v35  ;;  %v1655_v35 = vld [vmem:[#allocation2 + $0x260] ss:$8 sps:$4 sm:$0xff]  }
  0x51   :  { %609 = vmatpush1.bf16.msra.mxu0 %v1625_v15  ;;  %v1702_v15 = vld [vmem:[#allocation2 + $0x354] ss:$8 sps:$4 sm:$0xff]  }
  0x52   :  { %610 = vmatprep.subr.bf16.mxu0 %v1630_v16  ;;  %v1700_v16 = vld [vmem:[#allocation2 + $0x350] ss:$8 sps:$4 sm:$0xff]  }
  0x53   :  { %360 = vmatpush1.bf16.msra.mxu1 %v1588_v36  ;;  %v1660_v36 = vld [vmem:[#allocation2 + $0x274] ss:$8 sps:$4 sm:$0xff]  }
  0x54   :  { %839 = vmatprep.subr.bf16.mxu1 %v1639_v23  ;;  %v1714_v23 = vld [vmem:[#allocation2 + $0x394] ss:$8 sps:$4 sm:$0xff]  }
  0x55   :  { %611 = vmatpush1.bf16.msra.mxu0 %v1628_v17  ;;  %v1705_v17 = vld [vmem:[#allocation2 + $0x364] ss:$8 sps:$4 sm:$0xff]  }
  0x56   :  { %612 = vmatprep.subr.bf16.mxu0 %v1633_v18  ;;  %v1703_v18 = vld [vmem:[#allocation2 + $0x360] ss:$8 sps:$4 sm:$0xff]  }
  0x59   :  { %613 = vmatpush1.bf16.msra.mxu0 %v1631_v19  ;;  %v1708_v19 = vld [vmem:[#allocation2 + $0x374] ss:$8 sps:$4 sm:$0xff]  }
  0x5a   :  { %614 = vmatprep.subr.bf16.mxu0 %v1636_v20  ;;  %v1706_v20 = vld [vmem:[#allocation2 + $0x370] ss:$8 sps:$4 sm:$0xff]  }
  0x5d   :  { %615 = vmatpush1.bf16.msra.mxu0 %v1634_v21  ;;  %v1711_v21 = vld [vmem:[#allocation2 + $0x384] ss:$8 sps:$4 sm:$0xff]  }
  0xeb   :  { %v109_v4 = vpop.f32.mrb[0].mxu0 }
  0xec   :  { %v110_v5 = vadd.f32 %v109_v4, %v54_v2  ;;  %v111_v6 = vpop.f32.mrb[1].mxu0  ;;  %v1679_v2 = vld [vmem:[#allocation2 + $0x2e0] ss:$8 sps:$4 sm:$0xff]   ;;  %v1682_v4 = vld [vmem:[#allocation2 + $0x2f0] ss:$8 sps:$4 sm:$0xff]  }
  0xed   :  { %v112_v7 = vadd.f32 %v111_v6, %v58_v3  ;;  %v113_v8 = vpop.f32.mrb[2].mxu0  ;;  %v1684_v3 = vld [vmem:[#allocation2 + $0x2f4] ss:$8 sps:$4 sm:$0xff]   ;;  %v1687_v6 = vld [vmem:[#allocation2 + $0x304] ss:$8 sps:$4 sm:$0xff]  }
  0xee   :  { %v116_v9 = vmax.f32 %v110_v5, 0.0  ;;  %v114_v10 = vpop.f32.mrb[3].mxu0  ;;  %v1685_v5 = vld [vmem:[#allocation2 + $0x300] ss:$8 sps:$4 sm:$0xff]   ;;  %1094 = vmatprep.subr.bf16.mxu0 %v1687_v6  ;;  %v1688_v8 = vld [vmem:[#allocation2 + $0x310] ss:$8 sps:$4 sm:$0xff]  }
  0xef   :  { %v117_v11 = vmax.f32 %v112_v7, 0.0  ;;  %v1690_v7 = vld [vmem:[#allocation2 + $0x314] ss:$8 sps:$4 sm:$0xff]   ;;  %v1691_v10 = vld [vmem:[#allocation2 + $0x320] ss:$8 sps:$4 sm:$0xff]  }
  0xf0   :  { %v155_v13 = vpack.c.bf16 %v116_v9, %v116_v9  ;;  %v1693_v9 = vld [vmem:[#allocation2 + $0x324] ss:$8 sps:$4 sm:$0xff]  }
  0xf1   :  { %v156_v12 = vpack.c.bf16 %v117_v11, %v117_v11  ;;  %v1696_v11 = vld [vmem:[#allocation2 + $0x334] ss:$8 sps:$4 sm:$0xff]  }
  0xf3   :  { %361 = vmatprep.mubr.bf16.mxu1 %v156_v12  ;;  %v1694_v12 = vld [vmem:[#allocation2 + $0x330] ss:$8 sps:$4 sm:$0xff]  }
  0xf4   :  { %362 = vmatmul.mubr.bf16.vlgmr.msra.gmra.mrb[0].mxu1 %v155_v13  ;;  %v1699_v13 = vld [vmem:[#allocation2 + $0x344] ss:$8 sps:$4 sm:$0xff]  }
  0xf5   :  { %840 = vmatpush1.bf16.msra.mxu1 %v1637_v22  ;;  %v1709_v22 = vld [vmem:[#allocation2 + $0x380] ss:$8 sps:$4 sm:$0xff]  }
  0xf6   :  { %841 = vmatprep.subr.bf16.mxu1 %v1642_v24  ;;  %v1712_v24 = vld [vmem:[#allocation2 + $0x390] ss:$8 sps:$4 sm:$0xff]  }
  0xf9   :  { %842 = vmatpush1.bf16.msra.mxu1 %v1640_v25  ;;  %v1717_v25 = vld [vmem:[#allocation2 + $0x3a4] ss:$8 sps:$4 sm:$0xff]  }
  0xfa   :  { %843 = vmatprep.subr.bf16.mxu1 %v1645_v26  ;;  %v1715_v26 = vld [vmem:[#allocation2 + $0x3a0] ss:$8 sps:$4 sm:$0xff]  }
  0xfd   :  { %844 = vmatpush1.bf16.msra.mxu1 %v1643_v27  ;;  %v1720_v27 = vld [vmem:[#allocation2 + $0x3b4] ss:$8 sps:$4 sm:$0xff]  }
  0xfe   :  { %845 = vmatprep.subr.bf16.mxu1 %v1648_v28  ;;  %v1718_v28 = vld [vmem:[#allocation2 + $0x3b0] ss:$8 sps:$4 sm:$0xff]  }
 0x101   :  { %846 = vmatpush1.bf16.msra.mxu1 %v1646_v29  ;;  %v1393_v29 = vld [vmem:[%s1980_s5 + $0x2] sm:$0x3] }
 0x102   :  { %847 = vmatprep.subr.bf16.mxu1 %v1651_v30  ;;  %v417_v30 = vrot.slane %v1393_v29, %v1880_v63 }
 0x105   :  { %848 = vmatpush1.bf16.msra.mxu1 %v1649_v31  ;;  %v421_v31 = vrot.slane %v1393_v29, %v1885_v1 }
 0x106   :  { %849 = vmatprep.subr.bf16.mxu1 %v1654_v32 }
 0x109   :  { %850 = vmatpush1.bf16.msra.mxu1 %v1652_v33 }
 0x10a   :  { %851 = vmatprep.subr.bf16.mxu1 %v1657_v34 }
 0x10d   :  { %852 = vmatpush1.bf16.msra.mxu1 %v1655_v35 }
 0x10e   :  { %853 = vmatprep.subr.bf16.mxu1 %v1660_v36 }
 0x111   :  { %854 = vmatpush1.bf16.msra.mxu1 %v1658_v37 }
 0x112   :  { %855 = vmatprep.subr.bf16.mxu1 %v1663_v38 }
 0x115   :  { %856 = vmatpush1.bf16.msra.mxu1 %v1661_v39 }
 0x116   :  { %857 = vmatprep.subr.bf16.mxu1 %v1666_v40 }
 0x119   :  { %858 = vmatpush1.bf16.msra.mxu1 %v1664_v41 }
 0x11a   :  { %859 = vmatprep.subr.bf16.mxu1 %v1669_v42  ;;  %v1723_v42 = vld [vmem:[#allocation2 + $0x3c4] ss:$8 sps:$4 sm:$0xff]  }
 0x11d   :  { %860 = vmatpush1.bf16.msra.mxu1 %v1667_v43  ;;  %v1721_v43 = vld [vmem:[#allocation2 + $0x3c0] ss:$8 sps:$4 sm:$0xff]  }
 0x11e   :  { %861 = vmatprep.subr.bf16.mxu1 %v1672_v44  ;;  %v1726_v44 = vld [vmem:[#allocation2 + $0x3d4] ss:$8 sps:$4 sm:$0xff]  }
 0x121   :  { %862 = vmatpush1.bf16.msra.mxu1 %v1670_v45  ;;  %v1724_v45 = vld [vmem:[#allocation2 + $0x3d0] ss:$8 sps:$4 sm:$0xff]  }
 0x122   :  { %863 = vmatprep.subr.bf16.mxu1 %v1675_v59 }
 0x125   :  { %864 = vmatpush1.bf16.msra.mxu1 %v1673_v60 }
 0x126   :  { %865 = vmatprep.subr.bf16.mxu1 %v1678_v61 }
 0x129   :  { %866 = vmatpush1.bf16.msra.mxu1 %v1676_v62 }
 0x12a   :  { %867 = vmatprep.subr.bf16.mxu1 %v1681_v0 }
 0x12d   :  { %868 = vmatpush1.bf16.msra.mxu1 %v1679_v2 }
 0x12e   :  { %869 = vmatprep.subr.bf16.mxu1 %v1684_v3 }
 0x131   :  { %870 = vmatpush1.bf16.msra.mxu1 %v1682_v4 }
 0x1c7   :  { %v363_v49 = vpop.f32.mrb[0].mxu1 }
 0x1c8   :  { %v364_v50 = vadd.f32 %v363_v49, %v162_v47  ;;  %v365_v51 = vpop.f32.mrb[1].mxu1  ;;  %v1727_v47 = vld [vmem:[#allocation2 + $0x3e0] ss:$8 sps:$4 sm:$0xff]   ;;  %v1730_v49 = vld [vmem:[#allocation2 + $0x3f0] ss:$8 sps:$4 sm:$0xff]  }
 0x1c9   :  { %v366_v52 = vadd.f32 %v365_v51, %v166_v48  ;;  %v367_v53 = vpop.f32.mrb[2].mxu1  ;;  %v1732_v48 = vld [vmem:[#allocation2 + $0x3f4] ss:$8 sps:$4 sm:$0xff]   ;;  %v1734_v51 = vld [vmem:[%s1981_s6] sm:$0xff]  }
 0x1ca   :  { %1749 = vtanh.f32 %v364_v50  ;;  %v368_v54 = vpop.f32.mrb[3].mxu1  ;;  %v1733_v50 = vld [vmem:[%s1981_s6 + $0x40] sm:$0xff]   ;;  %v1736_v53 = vld [vmem:[%s1981_s6 + $0x8] sm:$0xff]  }
 0x1cb   :  { %v373_v55 = vmax.f32 %v366_v52, 0.0  ;;  %v1735_v52 = vld [vmem:[%s1981_s6 + $0x48] sm:$0xff]   ;;  %1509 = vmatprep.subr.bf16.mxu1 %v1733_v50  ;;  %v1737_v54 = vld [vmem:[%s1981_s6 + $0x50] sm:$0xff]  }
 0x1cd   :  { %v410_v56 = vpack.c.bf16 %v373_v55, %v373_v55  ;;  %v1738_v55 = vld [vmem:[%s1981_s6 + $0x10] sm:$0xff]  }
 0x1cf   :  { %616 = vmatprep.mubr.bf16.mxu0 %v410_v56  ;;  %v1739_v56 = vld [vmem:[%s1981_s6 + $0x58] sm:$0xff]  }
 0x1d4   :  { %v1750_v57 = vpop.eup %1749 }
 0x1d5   :  { %v409_v58 = vpack.c.bf16 %v1750_v57, %v1750_v57  ;;  %v1740_v57 = vld [vmem:[%s1981_s6 + $0x18] sm:$0xff]  }
 0x1d7   :  { %617 = vmatmul.mubr.bf16.vlgmr.msra.gmra.mrb[4].mxu0 %v409_v58  ;;  %v1426_v58 = vld [vmem:[%s1980_s5 + $0x4] sm:$0x3] }
 0x1d8   :  { %1095 = vmatpush1.bf16.msra.mxu0 %v1685_v5  ;;  %v672_v59 = vrot.slane %v1426_v58, %v1880_v63  ;;  %v676_v60 = vrot.slane %v1426_v58, %v1885_v1 }
 0x1d9   :  { %1096 = vmatprep.subr.bf16.mxu0 %v1690_v7 }
 0x1dc   :  { %1097 = vmatpush1.bf16.msra.mxu0 %v1688_v8 }
 0x1dd   :  { %1098 = vmatprep.subr.bf16.mxu0 %v1693_v9  ;;  %v1741_v9 = vld [vmem:[%s1981_s6 + $0x60] sm:$0xff]  }
 0x1e0   :  { %1099 = vmatpush1.bf16.msra.mxu0 %v1691_v10  ;;  %v1742_v10 = vld [vmem:[%s1981_s6 + $0x20] sm:$0xff]  }
 0x1e1   :  { %1100 = vmatprep.subr.bf16.mxu0 %v1696_v11  ;;  %v1743_v11 = vld [vmem:[%s1981_s6 + $0x68] sm:$0xff]  }
 0x1e4   :  { %1101 = vmatpush1.bf16.msra.mxu0 %v1694_v12  ;;  %v1744_v12 = vld [vmem:[%s1981_s6 + $0x28] sm:$0xff]  }
 0x1e5   :  { %1102 = vmatprep.subr.bf16.mxu0 %v1699_v13  ;;  %v1745_v13 = vld [vmem:[%s1981_s6 + $0x70] sm:$0xff]  }
 0x1e8   :  { %1103 = vmatpush1.bf16.msra.mxu0 %v1697_v14  ;;  %v1746_v14 = vld [vmem:[%s1981_s6 + $0x30] sm:$0xff]  }
 0x1e9   :  { %1104 = vmatprep.subr.bf16.mxu0 %v1702_v15  ;;  %v1747_v15 = vld [vmem:[%s1981_s6 + $0x78] sm:$0xff]  }
 0x1ec   :  { %1105 = vmatpush1.bf16.msra.mxu0 %v1700_v16  ;;  %v1748_v16 = vld [vmem:[%s1981_s6 + $0x38] sm:$0xff]   ;;  %s1812_s6 = smov 124  }
 0x1ed   :  { %1106 = vmatprep.subr.bf16.mxu0 %v1705_v17  ;;  %v1322_v17 = vld [vmem:[%s1976_s1] sm:$0xff] }
 0x1ee   :  { %1324 = vrot.lane.b32.xlu0 %v1322_v17, %s1811_s15 }
 0x1f0   :  { %1107 = vmatpush1.bf16.msra.mxu0 %v1703_v18  ;;  %v1459_v18 = vld [vmem:[%s1980_s5 + $0x6] sm:$0x3] }
 0x1f1   :  { %1108 = vmatprep.subr.bf16.mxu0 %v1708_v19  ;;  %v927_v19 = vrot.slane %v1459_v18, %v1880_v63  ;;  %v1492_v63 = vld [vmem:[%s1982_s7] ss:$0 sm:$0xff]  ;;  %s1781_s7 = scalar_lea.vmem %s1350_s19, 128 }
 0x1f2   :  { %p1782_p8 = scmp.ne.s32.totalorder %s1350_s19, %s1781_s7  ;;  %p1787_p10 = scmp.lt.s32.totalorder %s1781_s7, %s1781_s7 }
 0x1f4   :  { %1109 = vmatpush1.bf16.msra.mxu0 %v1706_v20  ;;  %v931_v20 = vrot.slane %v1459_v18, %v1885_v1  ;;  %p1788_p11 = por %p1787_p10, %p1786_p9 }
 0x1f5   :  { %1110 = vmatprep.subr.bf16.mxu0 %v1711_v21 }
 0x1f6   :  { %p1789_p12 = pnand %p1788_p11, %p1782_p8 }
 0x1f8   :  { %1111 = vmatpush1.bf16.msra.mxu0 %v1709_v22 }
 0x1f9   :  { %1112 = vmatprep.subr.bf16.mxu0 %v1714_v23 }
 0x1fc   :  { %1113 = vmatpush1.bf16.msra.mxu0 %v1712_v24 }
 0x1fd   :  { %1114 = vmatprep.subr.bf16.mxu0 %v1717_v25 }
 0x200   :  { %1115 = vmatpush1.bf16.msra.mxu0 %v1715_v26 }
 0x201   :  { %1116 = vmatprep.subr.bf16.mxu0 %v1720_v27 }
 0x204   :  { %1117 = vmatpush1.bf16.msra.mxu0 %v1718_v28 }
 0x205   :  { %1118 = vmatprep.subr.bf16.mxu0 %v1723_v42 }
 0x208   :  { %1119 = vmatpush1.bf16.msra.mxu0 %v1721_v43 }
 0x209   :  { %1120 = vmatprep.subr.bf16.mxu0 %v1726_v44 }
 0x20c   :  { %1121 = vmatpush1.bf16.msra.mxu0 %v1724_v45 }
 0x20d   :  { %1122 = vmatprep.subr.bf16.mxu0 %v1729_v46 }
 0x210   :  { %1123 = vmatpush1.bf16.msra.mxu0 %v1727_v47 }
 0x211   :  { %1124 = vmatprep.subr.bf16.mxu0 %v1732_v48 }
 0x214   :  { %1125 = vmatpush1.bf16.msra.mxu0 %v1730_v49 }
 0x2aa   :  { %v618_v32 = vpop.f32.mrb[4].mxu0 }
 0x2ab   :  { %v619_v33 = vadd.f32 %v618_v32, %v417_v30  ;;  %v620_v34 = vpop.f32.mrb[5].mxu0 }
 0x2ac   :  { %v621_v35 = vadd.f32 %v620_v34, %v421_v31  ;;  %v622_v36 = vpop.f32.mrb[6].mxu0 }
 0x2ad   :  { %1751 = vtanh.f32 %v619_v33  ;;  %v623_v37 = vpop.f32.mrb[7].mxu0 }
 0x2ae   :  { %v628_v38 = vmax.f32 %v621_v35, 0.0 }
 0x2b0   :  { %v665_v39 = vpack.c.bf16 %v628_v38, %v628_v38 }
 0x2b2   :  { %871 = vmatprep.mubr.bf16.mxu1 %v665_v39  ;;  %v1325_v39 = vpop.permute.xlu0 %1324 }
 0x2b7   :  { %v1752_v40 = vpop.eup %1751 }
 0x2b8   :  { %v664_v41 = vpack.c.bf16 %v1752_v40, %v1752_v40 }
 0x2ba   :  { %872 = vmatmul.mubr.bf16.vlgmr.msra.gmra.mrb[4].mxu1 %v664_v41 }
 0x2bb   :  { %1510 = vmatpush3.bf16.msra.mxu1 %v1734_v51 }
 0x2bc   :  { %1511 = vmatprep.subr.bf16.mxu1 %v1735_v52 }
 0x2bf   :  { %1512 = vmatpush3.bf16.msra.mxu1 %v1736_v53 }
 0x2c0   :  { %1513 = vmatprep.subr.bf16.mxu1 %v1737_v54 }
 0x2c3   :  { %1514 = vmatpush3.bf16.msra.mxu1 %v1738_v55 }
 0x2c4   :  { %1515 = vmatprep.subr.bf16.mxu1 %v1739_v56 }
 0x2c7   :  { %1516 = vmatpush3.bf16.msra.mxu1 %v1740_v57 }
 0x2c8   :  { %1517 = vmatprep.subr.bf16.mxu1 %v1741_v9 }
 0x2cb   :  { %1518 = vmatpush3.bf16.msra.mxu1 %v1742_v10 }
 0x2cc   :  { %1519 = vmatprep.subr.bf16.mxu1 %v1743_v11 }
 0x2cf   :  { %1520 = vmatpush3.bf16.msra.mxu1 %v1744_v12 }
 0x2d0   :  { %1521 = vmatprep.subr.bf16.mxu1 %v1745_v13 }
 0x2d3   :  { %1522 = vmatpush3.bf16.msra.mxu1 %v1746_v14 }
 0x2d4   :  { %1523 = vmatprep.subr.bf16.mxu1 %v1747_v15 }
 0x2d7   :  { %1524 = vmatpush3.bf16.msra.mxu1 %v1748_v16 }
 0x38d   :  { %v873_v61 = vpop.f32.mrb[4].mxu1 }
 0x38e   :  { %v874_v62 = vadd.f32 %v873_v61, %v672_v59  ;;  %v875_v0 = vpop.f32.mrb[5].mxu1 }
 0x38f   :  { %v876_v2 = vadd.f32 %v875_v0, %v676_v60  ;;  %v877_v3 = vpop.f32.mrb[6].mxu1 }
 0x390   :  { %1753 = vtanh.f32 %v874_v62  ;;  %v878_v4 = vpop.f32.mrb[7].mxu1 }
 0x391   :  { %v883_v5 = vmax.f32 %v876_v2, 0.0 }
 0x393   :  { %v920_v6 = vpack.c.bf16 %v883_v5, %v883_v5 }
 0x395   :  { %1126 = vmatprep.mubr.bf16.mxu0 %v920_v6 }
 0x39a   :  { %v1754_v7 = vpop.eup %1753 }
 0x39b   :  { %v919_v8 = vpack.c.bf16 %v1754_v7, %v1754_v7 }
 0x39d   :  { %1127 = vmatmul.mubr.bf16.vlgmr.msra.gmra.mrb[8].mxu0 %v919_v8 }
 0x470   :  { %v1128_v21 = vpop.f32.mrb[8].mxu0 }
 0x471   :  { %v1129_v22 = vadd.f32 %v1128_v21, %v927_v19  ;;  %v1130_v23 = vpop.f32.mrb[9].mxu0 }
 0x472   :  { %v1131_v24 = vadd.f32 %v1130_v23, %v931_v20  ;;  %v1132_v25 = vpop.f32.mrb[10].mxu0 }
 0x473   :  { %1755 = vtanh.f32 %v1129_v22  ;;  %v1133_v26 = vpop.f32.mrb[11].mxu0 }
 0x474   :  { %v1138_v27 = vmax.f32 %v1131_v24, 0.0 }
 0x476   :  { %v1174_v28 = vpack.c.bf16 %v1138_v27, %v1138_v27 }
 0x478   :  { %1310 = vmatprep.mubr.bf16.mxu1 %v1174_v28 }
 0x47d   :  { %v1756_v29 = vpop.eup %1755 }
 0x47e   :  { %v1173_v30 = vpack.c.bf16 %v1756_v29, %v1756_v29 }
 0x480   :  { %1311 = vmatmul.mubr.bf16.vlgmr.msra.gmra.mrb[8].mxu1 %v1173_v30 }
 0x553   :  { %v1525_v31 = vpop.f32.mrb[8].mxu1 }
 0x554   :  { %v1526_v32 = vpop.f32.mrb[9].mxu1 }
 0x555   :  { %v1527_v1 = vadd.f32 %v1526_v32, %v1525_v31  ;;  %v1528_v33 = vpop.f32.mrb[10].mxu1 }
 0x556   :  { %v1529_v34 = vpop.f32.mrb[11].mxu1 }
 0x557   :  { %v1313_v35 = vadd.f32 %v1527_v1, %v1492_v63 }
 0x559   :  { %1336 = vrot.lane.b32.xlu1 %v1313_v35, %s1811_s15  ;;  %v1318_v36 = vmul.f32 0.5, %v1313_v35 }
 0x55b   :  { %v1319_v37 = vmul.f32 1.442695, %v1318_v36 }
 0x55d   :  { %1757 = vpow2.f32 %v1319_v37 }
 0x567   :  { %v1758_v38 = vpop.eup %1757 }
 0x568   :  { %v1321_v40 = vadd.f32 1e-05, %v1758_v38 }
 0x56a   :  { %v1327_v41 = vmul.f32 %v1325_v39, %v1321_v40 }
 0x56c   :  { %1329 = vrot.lane.b32.xlu0 %v1327_v41, %s1812_s6 }
 0x5cb   :  { %v1337_v44 = vpop.permute.xlu1 %1336 }
 0x5de   :  { %v1330_v42 = vpop.permute.xlu0 %1329 }
 0x5df   :  { %v1332_v43 = vadd.f32 %v1330_v42, %v1313_v35 }
 0x5e1   :  { %1334 = vst.msk [vmem:[#allocation5] sm:$0xff] %vm1333_vm1, %v1332_v43 }
 0x5e2   :  { %1340 = vst.msk [vmem:[#allocation5] sm:$0xff] %vm1339_vm2, %v1337_v44 }
 0x5e3   :  { %1342 = vst.msk [vmem:[#allocation5] sm:$0xff] %vm1341_vm3, %v1337_v44 }
 0x5e4   :  { %1792 = shalt.err (!%p1789_p12)
}
 0x5e5   :  { %s1793_s22 = scalar_lea.hbm %s1983_s8, 128 }
 0x5e6   :  { %p1794_p13 = scmp.ne.s32.totalorder %s1983_s8, %s1793_s22  ;;  %p1797_p0 = scmp.lt.u32.totalorder %s1793_s22, %s1983_s8 }
 0x5e8   :  { %p1799_p1 = pnand %p1797_p0, %p1794_p13 }
 0x5ea   :  { %1802 = shalt.err (!%p1799_p1)
}
 0x5eb   :  { %1352 = dma.vmem_to_hbm [thread:$0]  %s1350_s19, 128, %s1983_s8, [#allocation4]  }
 0x5ec   :  { %1805 = dma.done.wait [#allocation4], 128  }
 0x5ed   :  { %1806 = vsyncadd [#allocation4], 4294967168 }
 0x5ee   :  { %1356 = vsyncpa [#allocation3], 1 }
 0x5ef   :  { %1357 = vsyncpa [#allocation4], 1 }

</bundles_post_ra>
